<compile_context>
chip_gen: v5e
topology: v5e:2x2
jax: 0.10.0
libtpu: 0.0.40
codegen_flags: <defaults>
</compile_context>

<pallas_src>
import functools

import jax
import jax.numpy as jnp
from jax.experimental import pallas as pl
from jax.experimental.pallas import tpu as pltpu


def wind_cross_atten_kernel(xqv_ref, xk_ref, wf_ref, wp_ref, bp_ref, out_ref,
                            *, num_heads, block_b, seq_len, compute_dtype,
                            approx_recip):
    M, C = xqv_ref.shape                     # M = block_b * seq_len (flat rows)
    head_dim = C // num_heads

    # ---- fused q/v/k projection: ONE MXU push -------------------------------
    # [x_qv | x_k] (M, 2C) @ block-diagonal fused weight (2C, 3C) whose output
    # columns are [q (scale pre-folded) | v | k].
    x_cat = jnp.concatenate([xqv_ref[...], xk_ref[...]], axis=-1)   # lane concat
    qvk = jnp.dot(x_cat, wf_ref[...],
                  preferred_element_type=jnp.float32)               # (M, 3C) f32

    # ---- heads -> batch dim (cheap leading-dim stacks, no attention loop) ---
    def head_stack(col0):
        # Per-head lane slices starting at column `col0`, stacked along a new
        # leading batch axis: (num_heads*block_b, N, hd); batch index = h*Bb+b.
        parts = [
            qvk[:, col0 + h * head_dim: col0 + (h + 1) * head_dim]
               .reshape(block_b, seq_len, head_dim)
            for h in range(num_heads)
        ]
        return jnp.concatenate(parts, axis=0).astype(compute_dtype)

    q_bh = head_stack(0)            # softmax scale already folded into weight
    v_bh = head_stack(C)
    k_bh = head_stack(2 * C)

    # ---- attention: ONE scores dot, ONE softmax, ONE p@v dot ---------------
    att = jnp.einsum('bqd,bkd->bqk', q_bh, k_bh,
                     preferred_element_type=jnp.float32)   # (H*Bb, N, N) f32
    att = att - jnp.max(att, axis=-1, keepdims=True)
    p = jnp.exp(att)
    s = jnp.sum(p, axis=-1, keepdims=True)
    if approx_recip:
        # bf16 MXU path: approx reciprocal rides the EUP slot.
        p = p * pl.reciprocal(s, approx=True)
    else:
        # f32 parity path: exact divide (matches the reference softmax).
        p = p / s

    xh = jnp.einsum('bqk,bkd->bqd', p.astype(compute_dtype), v_bh,
                    preferred_element_type=jnp.float32)    # (H*Bb, N, hd) f32

    # ---- heads back to lanes, single output projection ----------------------
    xh_all = jnp.concatenate(
        [xh[h * block_b:(h + 1) * block_b].reshape(M, head_dim)
         for h in range(num_heads)], axis=-1)              # (M, C) lane concat

    out = jnp.dot(xh_all.astype(wp_ref.dtype), wp_ref[...],
                  preferred_element_type=jnp.float32)      # ONE proj push
    # NOTE: out last dim is C (=32) < 128 lanes -> masked vst; negligible at
    # this M.  If reused at large M, present a lane-dense out_spec instead.
    out_ref[...] = (out + bp_ref[...]).astype(out_ref.dtype)


def prepare_wind_cross_atten_params(w_k, w_qv, w_proj, b_proj, *, num_heads=2,
                                    mxu_dtype=None):
    """Build fused / transposed / scale-folded parameters ONCE (at init time).

    w_k    : (C, C)   PyTorch nn.Linear layout (out_features, in_features)
    w_qv   : (2C, C)  PyTorch layout
    w_proj : (C, C)   PyTorch layout
    b_proj : (C,)
    mxu_dtype: None (f32 MXU operands) or jnp.bfloat16 (bf16 MXU operands,
               f32 softmax/accumulation).  bf16 is fine on v5e/v6e/v7x.
    """
    C = w_k.shape[0]
    assert w_k.shape == (C, C)
    assert w_qv.shape == (2 * C, C)
    assert w_proj.shape == (C, C)
    assert b_proj.shape == (C,)
    assert C % num_heads == 0
    head_dim = C // num_heads
    scale = head_dim ** (-0.5)

    w_qv_t = jnp.asarray(w_qv, jnp.float32).T            # (C, 2C) : [q | v]
    w_k_t = jnp.asarray(w_k, jnp.float32).T              # (C, C)

    # Fold the softmax scale into the q columns (constant fold, not an
    # activation pre-scale).
    wq = w_qv_t[:, :C] * scale
    wv = w_qv_t[:, C:]

    # Block-diagonal fused weight: [x_qv | x_k] @ w_fused = [q*scale | v | k].
    w_fused = jnp.zeros((2 * C, 3 * C), jnp.float32)
    w_fused = w_fused.at[:C, :C].set(wq)
    w_fused = w_fused.at[:C, C:2 * C].set(wv)
    w_fused = w_fused.at[C:, 2 * C:].set(w_k_t)

    w_p_t = jnp.asarray(w_proj, jnp.float32).T            # (C, C)
    b_p = jnp.asarray(b_proj, jnp.float32).reshape(1, C)  # f32 bias

    if mxu_dtype is not None:
        w_fused = w_fused.astype(mxu_dtype)
        w_p_t = w_p_t.astype(mxu_dtype)

    return dict(w_fused=w_fused, w_p_t=w_p_t, b_p=b_p, dim=C,
                num_heads=num_heads, mxu_dtype=mxu_dtype)


def wind_cross_atten(cinfo, clen, params, *, block_b=None):
    """Wind_Cross_Atten forward.  cinfo, clen: (B, N, C); params from
    prepare_wind_cross_atten_params()."""
    B, N, C = cinfo.shape
    assert clen.shape == (B, N, C)
    assert C == params['dim']
    num_heads = params['num_heads']
    mxu_dtype = params['mxu_dtype']
    compute_dtype = jnp.float32 if mxu_dtype is None else mxu_dtype

    if block_b is None:
        # TODO(synk): on v7x with real-model B, pick block_b = B // 2 (>= 2
        # "parallel" grid steps) so both TensorCores get work -- but only once
        # per-step compute exceeds the ~0.35us per-step pipeline overhead.
        block_b = B
    assert B % block_b == 0
    M = block_b * N
    if block_b < B:
        # (8,128) rule: second-to-last block dim must be a multiple of 8 when
        # the block is not the full array extent.
        assert M % 8 == 0, "block_b * N must be a multiple of 8 when block_b < B"

    # Flatten (B, N, C) -> (B*N, C) row slabs (free, row-major reshape).
    x_qv = cinfo.reshape(B * N, C)
    x_k = clen.reshape(B * N, C)
    if mxu_dtype is not None:
        x_qv = x_qv.astype(mxu_dtype)
        x_k = x_k.astype(mxu_dtype)

    kern = functools.partial(
        wind_cross_atten_kernel, num_heads=num_heads, block_b=block_b,
        seq_len=N, compute_dtype=compute_dtype,
        approx_recip=(mxu_dtype is not None))

    out_flat = pl.pallas_call(
        kern,
        out_shape=jax.ShapeDtypeStruct((B * N, C), cinfo.dtype),
        grid=(B // block_b,),
        in_specs=[
            pl.BlockSpec((M, C), lambda i: (i, 0)),           # cinfo rows (per step)
            pl.BlockSpec((M, C), lambda i: (i, 0)),           # clen rows  (per step)
            pl.BlockSpec((2 * C, 3 * C), lambda i: (0, 0)),   # fused W   (resident)
            pl.BlockSpec((C, C), lambda i: (0, 0)),           # W_proj^T  (resident)
            pl.BlockSpec((1, C), lambda i: (0, 0)),           # b_proj    (resident)
        ],
        out_specs=pl.BlockSpec((M, C), lambda i: (i, 0)),
        compiler_params=pltpu.CompilerParams(
            dimension_semantics=("parallel",)),
    )(x_qv, x_k, params['w_fused'], params['w_p_t'], params['b_p'])

    return out_flat.reshape(B, N, C)


def ref_forward(cinfo, clen, w_k, w_qv, w_proj, b_proj, num_heads):
    """Pure-JAX reference mirroring the PyTorch forward (weights in (out,in))."""
    B, N, C = cinfo.shape
    hd = C // num_heads
    k = clen @ w_k.T                                   # (B, N, C)
    qv = cinfo @ w_qv.T                                # (B, N, 2C)
    q, v = qv[..., :C], qv[..., C:]
    q = q.reshape(B, N, num_heads, hd).transpose(0, 2, 1, 3)
    k = k.reshape(B, N, num_heads, hd).transpose(0, 2, 1, 3)
    v = v.reshape(B, N, num_heads, hd).transpose(0, 2, 1, 3)
    att = jnp.einsum('bhnd,bhmd->bhnm', q, k) * (hd ** -0.5)
    att = jax.nn.softmax(att, axis=-1)
    x = jnp.einsum('bhnm,bhmd->bhnd', att, v)
    x = x.transpose(0, 2, 1, 3).reshape(B, N, C)
    return x @ w_proj.T + b_proj


if __name__ == "__main__":
    B, N, C = 2, 8, 32
    num_heads = 2

    key = jax.random.PRNGKey(0)
    k1, k2, k3, k4, k5, k6 = jax.random.split(key, 6)

    cinfo = jax.random.normal(k1, (B, N, C), dtype=jnp.float32)
    clen = jax.random.normal(k2, (B, N, C), dtype=jnp.float32)

    # Parameters in PyTorch nn.Linear layout: weight = (out_features, in_features)
    w_k = jax.random.normal(k3, (C, C), dtype=jnp.float32) * 0.1
    w_qv = jax.random.normal(k4, (2 * C, C), dtype=jnp.float32) * 0.1
    w_proj = jax.random.normal(k5, (C, C), dtype=jnp.float32) * 0.1
    b_proj = jax.random.normal(k6, (C,), dtype=jnp.float32) * 0.1

    ref = ref_forward(cinfo, clen, w_k, w_qv, w_proj, b_proj, num_heads)

    # f32 parity path: exact softmax divide, f32 MXU operands.
    params_f32 = prepare_wind_cross_atten_params(
        w_k, w_qv, w_proj, b_proj, num_heads=num_heads, mxu_dtype=None)
    out = wind_cross_atten(cinfo, clen, params_f32)
    out = jax.block_until_ready(out)
    assert out.shape == (B, N, C)
    assert jnp.allclose(out, ref, atol=1e-2, rtol=1e-2), \
        "mismatch vs JAX reference (f32 path)"

    # bf16 MXU path (all generations): bf16 operands, f32 softmax/accumulation.
    params_bf16 = prepare_wind_cross_atten_params(
        w_k, w_qv, w_proj, b_proj, num_heads=num_heads, mxu_dtype=jnp.bfloat16)
    out_bf16 = wind_cross_atten(cinfo, clen, params_bf16)
    out_bf16 = jax.block_until_ready(out_bf16)
    assert out_bf16.shape == (B, N, C)
    assert jnp.allclose(out_bf16, ref, atol=5e-2, rtol=5e-2), \
        "mismatch vs JAX reference (bf16 MXU path)"

    print("KERNEL_OK")
</pallas_src>

<mosaic_0001>
module attributes {stable_mosaic.version = 11 : i64} {
  func.func @wind_cross_atten_kernel(%arg0: i32, %arg1: memref<16x32xf32, #tpu.memory_space<vmem>>, %arg2: memref<16x32xf32, #tpu.memory_space<vmem>>, %arg3: memref<64x96xf32, #tpu.memory_space<vmem>>, %arg4: memref<32x32xf32, #tpu.memory_space<vmem>>, %arg5: memref<1x32xf32, #tpu.memory_space<vmem>>, %arg6: memref<16x32xf32, #tpu.memory_space<vmem>>) attributes {dimension_semantics = [#tpu.dimension_semantics<parallel>], iteration_bounds = array<i64: 1>, scalar_prefetch = 0 : i64, scratch_operands = 0 : i64, tpu.core_type = #tpu.core_type<tc>, window_params = [{transform_indices = @transform_0, window_bounds = array<i64: 16, 32>}, {transform_indices = @transform_1, window_bounds = array<i64: 16, 32>}, {pipeline_mode = #tpu.pipeline_mode<synchronous>, transform_indices = @transform_2, window_bounds = array<i64: 64, 96>}, {pipeline_mode = #tpu.pipeline_mode<synchronous>, transform_indices = @transform_3, window_bounds = array<i64: 32, 32>}, {pipeline_mode = #tpu.pipeline_mode<synchronous>, transform_indices = @transform_4, window_bounds = array<i64: 1, 32>}, {transform_indices = @transform_5, window_bounds = array<i64: 16, 32>}]} {
    %c0 = arith.constant 0 : index
    %c0_0 = arith.constant 0 : index
    %0 = vector.load %arg1[%c0, %c0_0] : memref<16x32xf32, #tpu.memory_space<vmem>>, vector<16x32xf32>
    %c0_1 = arith.constant 0 : index
    %c0_2 = arith.constant 0 : index
    %1 = vector.load %arg2[%c0_1, %c0_2] : memref<16x32xf32, #tpu.memory_space<vmem>>, vector<16x32xf32>
    %2 = tpu.concatenate %0, %1 in 1 : vector<16x32xf32>, vector<16x32xf32> -> vector<16x64xf32>
    %c0_3 = arith.constant 0 : index
    %c0_4 = arith.constant 0 : index
    %3 = vector.load %arg3[%c0_3, %c0_4] : memref<64x96xf32, #tpu.memory_space<vmem>>, vector<64x96xf32>
    %cst = arith.constant dense<0.000000e+00> : vector<16x96xf32>
    %4 = tpu.matmul %2, %3, %cst {dimension_numbers = #tpu.dot_dimension_numbers<[1], [0], [0], [1], [0, 0, 1, 1], [], []>} : vector<16x64xf32>, vector<64x96xf32>, vector<16x96xf32> -> vector<16x96xf32>
    %5 = vector.extract_strided_slice %4 {offsets = [0, 0], sizes = [16, 16], strides = [1, 1]} : vector<16x96xf32> to vector<16x16xf32>
    %6 = vector.shape_cast %5 : vector<16x16xf32> to vector<2x8x16xf32>
    %7 = vector.extract_strided_slice %4 {offsets = [0, 16], sizes = [16, 16], strides = [1, 1]} : vector<16x96xf32> to vector<16x16xf32>
    %8 = vector.shape_cast %7 : vector<16x16xf32> to vector<2x8x16xf32>
    %9 = tpu.concatenate %6, %8 in 0 : vector<2x8x16xf32>, vector<2x8x16xf32> -> vector<4x8x16xf32>
    %10 = vector.extract_strided_slice %4 {offsets = [0, 32], sizes = [16, 16], strides = [1, 1]} : vector<16x96xf32> to vector<16x16xf32>
    %11 = vector.shape_cast %10 : vector<16x16xf32> to vector<2x8x16xf32>
    %12 = vector.extract_strided_slice %4 {offsets = [0, 48], sizes = [16, 16], strides = [1, 1]} : vector<16x96xf32> to vector<16x16xf32>
    %13 = vector.shape_cast %12 : vector<16x16xf32> to vector<2x8x16xf32>
    %14 = tpu.concatenate %11, %13 in 0 : vector<2x8x16xf32>, vector<2x8x16xf32> -> vector<4x8x16xf32>
    %15 = vector.extract_strided_slice %4 {offsets = [0, 64], sizes = [16, 16], strides = [1, 1]} : vector<16x96xf32> to vector<16x16xf32>
    %16 = vector.shape_cast %15 : vector<16x16xf32> to vector<2x8x16xf32>
    %17 = vector.extract_strided_slice %4 {offsets = [0, 80], sizes = [16, 16], strides = [1, 1]} : vector<16x96xf32> to vector<16x16xf32>
    %18 = vector.shape_cast %17 : vector<16x16xf32> to vector<2x8x16xf32>
    %19 = tpu.concatenate %16, %18 in 0 : vector<2x8x16xf32>, vector<2x8x16xf32> -> vector<4x8x16xf32>
    "tpu.trace_start"() <{level = 10 : i32, message = "bqd,bkd->bqk"}> : () -> ()
    %cst_5 = arith.constant dense<0.000000e+00> : vector<4x8x8xf32>
    %20 = tpu.matmul %9, %19, %cst_5 {dimension_numbers = #tpu.dot_dimension_numbers<[2], [2], [1], [1], [0, 0, 0, 1, 1, 1], [0], [0]>} : vector<4x8x16xf32>, vector<4x8x16xf32>, vector<4x8x8xf32> -> vector<4x8x8xf32>
    "tpu.trace_stop"() : () -> ()
    %cst_6 = arith.constant dense<0xFF800000> : vector<4x8xf32>
    %21 = vector.multi_reduction <maximumf>, %20, %cst_6 [2] : vector<4x8x8xf32> to vector<4x8xf32>
    %22 = vector.shape_cast %21 : vector<4x8xf32> to vector<4x8x1xf32>
    %23 = vector.broadcast %22 : vector<4x8x1xf32> to vector<4x8x8xf32>
    %24 = arith.subf %20, %23 : vector<4x8x8xf32>
    %25 = math.exp %24 : vector<4x8x8xf32>
    %cst_7 = arith.constant dense<0.000000e+00> : vector<4x8xf32>
    %26 = vector.multi_reduction <add>, %25, %cst_7 [2] : vector<4x8x8xf32> to vector<4x8xf32>
    %27 = vector.shape_cast %26 : vector<4x8xf32> to vector<4x8x1xf32>
    %28 = vector.broadcast %27 : vector<4x8x1xf32> to vector<4x8x8xf32>
    %29 = arith.divf %25, %28 : vector<4x8x8xf32>
    "tpu.trace_start"() <{level = 10 : i32, message = "bqk,bkd->bqd"}> : () -> ()
    %cst_8 = arith.constant dense<0.000000e+00> : vector<4x8x16xf32>
    %30 = tpu.matmul %29, %14, %cst_8 {dimension_numbers = #tpu.dot_dimension_numbers<[2], [1], [1], [2], [0, 0, 0, 1, 1, 2], [0], [0]>} : vector<4x8x8xf32>, vector<4x8x16xf32>, vector<4x8x16xf32> -> vector<4x8x16xf32>
    "tpu.trace_stop"() : () -> ()
    %31 = vector.extract_strided_slice %30 {offsets = [0, 0, 0], sizes = [2, 8, 16], strides = [1, 1, 1]} : vector<4x8x16xf32> to vector<2x8x16xf32>
    %32 = vector.shape_cast %31 : vector<2x8x16xf32> to vector<16x16xf32>
    %33 = vector.extract_strided_slice %30 {offsets = [2, 0, 0], sizes = [2, 8, 16], strides = [1, 1, 1]} : vector<4x8x16xf32> to vector<2x8x16xf32>
    %34 = vector.shape_cast %33 : vector<2x8x16xf32> to vector<16x16xf32>
    %35 = tpu.concatenate %32, %34 in 1 : vector<16x16xf32>, vector<16x16xf32> -> vector<16x32xf32>
    %c0_9 = arith.constant 0 : index
    %c0_10 = arith.constant 0 : index
    %36 = vector.load %arg4[%c0_9, %c0_10] : memref<32x32xf32, #tpu.memory_space<vmem>>, vector<32x32xf32>
    %cst_11 = arith.constant dense<0.000000e+00> : vector<16x32xf32>
    %37 = tpu.matmul %35, %36, %cst_11 {dimension_numbers = #tpu.dot_dimension_numbers<[1], [0], [0], [1], [0, 0, 1, 1], [], []>} : vector<16x32xf32>, vector<32x32xf32>, vector<16x32xf32> -> vector<16x32xf32>
    %c0_12 = arith.constant 0 : index
    %c0_13 = arith.constant 0 : index
    %38 = vector.load %arg5[%c0_12, %c0_13] : memref<1x32xf32, #tpu.memory_space<vmem>>, vector<1x32xf32>
    %39 = vector.broadcast %38 : vector<1x32xf32> to vector<16x32xf32>
    %40 = arith.addf %37, %39 : vector<16x32xf32>
    %c0_14 = arith.constant 0 : index
    %c0_15 = arith.constant 0 : index
    %41 = vector.load %arg6[%c0_14, %c0_15] : memref<16x32xf32, #tpu.memory_space<vmem>>, vector<16x32xf32>
    tpu.vector_store %arg6[%c0_14, %c0_15], %40 {strides = array<i32>} : memref<16x32xf32, #tpu.memory_space<vmem>>, vector<16x32xf32>,
    return
  }
  func.func @transform_0(%arg0: i32) -> (i32, i32) {
    %c0_i32 = arith.constant 0 : i32
    %c0_i32_0 = arith.constant 0 : i32
    return %arg0, %c0_i32 : i32, i32
  }
  func.func @transform_1(%arg0: i32) -> (i32, i32) {
    %c0_i32 = arith.constant 0 : i32
    %c0_i32_0 = arith.constant 0 : i32
    return %arg0, %c0_i32 : i32, i32
  }
  func.func @transform_2(%arg0: i32) -> (i32, i32) {
    %c0_i32 = arith.constant 0 : i32
    %c0_i32_0 = arith.constant 0 : i32
    %c0_i32_1 = arith.constant 0 : i32
    return %c0_i32, %c0_i32_0 : i32, i32
  }
  func.func @transform_3(%arg0: i32) -> (i32, i32) {
    %c0_i32 = arith.constant 0 : i32
    %c0_i32_0 = arith.constant 0 : i32
    %c0_i32_1 = arith.constant 0 : i32
    return %c0_i32, %c0_i32_0 : i32, i32
  }
  func.func @transform_4(%arg0: i32) -> (i32, i32) {
    %c0_i32 = arith.constant 0 : i32
    %c0_i32_0 = arith.constant 0 : i32
    %c0_i32_1 = arith.constant 0 : i32
    return %c0_i32, %c0_i32_0 : i32, i32
  }
  func.func @transform_5(%arg0: i32) -> (i32, i32) {
    %c0_i32 = arith.constant 0 : i32
    %c0_i32_0 = arith.constant 0 : i32
    return %arg0, %c0_i32 : i32, i32
  }
}

</mosaic_0001>

<bundles_post_ra>
// kernel: tpu_custom_call.1
= control target key start
LH: loop header
LB: loop body
LE: loop exit
PB: predicated region body
PF: predicated region fallthrough
CT: control target
= control target key end

     0   :  { %10 = vsyncpa [#allocation3], 0  ;;  %s819_s0 = inlined_call_operand.hbm [shape: f32[16,32], index: 0, kind: input, shape index: {}]   ;;  %s820_s1 = inlined_call_operand.hbm [shape: f32[16,32], index: 1, kind: input, shape index: {}]   ;;  %s821_s2 = inlined_call_operand.hbm [shape: f32[64,96], index: 2, kind: input, shape index: {}]   ;;  %s822_s3 = inlined_call_operand.hbm [shape: f32[32,32], index: 3, kind: input, shape index: {}]   ;;  %s823_s4 = inlined_call_operand.vmem [shape: f32[1,32], index: 4, kind: input, shape index: {}]   ;;  %s824_s5 = inlined_call_operand.hbm [shape: f32[16,32], index: 5, kind: output, shape index: {}]  }
   0x1   :  { %11 = vsyncpa [#allocation6], 0 }
   0x2   :  { %12 = vsyncpa [#allocation9], 0 }
   0x3   :  { %13 = vsyncpa [#allocation4], 0  ;;  %s31_s20 = sshll.u32 %s820_s1, 4  ;;  %s697_s21 = smov [#allocation5]   ;;  %s32_s20 = int_to_ptr.hbm [resolvable:$true] %s31_s20 }
   0x4   :  { %s33_s22 = sshll.u32 %s697_s21, 4  ;;  %s18_s25 = sshll.u32 %s819_s0, 4  ;;  %s34_s22 = int_to_ptr.vmem [resolvable:$true] %s33_s22  ;;  %s19_s25 = int_to_ptr.hbm [resolvable:$true] %s18_s25 }
   0x5   :  { %s698_s26 = smov 128   ;;  %s699_s27 = smov 8  }
   0x6   :  { %39 = dma.hbm_to_vmem [thread:$0]  %s32_s20, 256, %s34_s22, [#allocation6], %s698_s26, %s698_s26, %s699_s27  }
   0x7   :  { %s700_s28 = smov [#allocation2]   ;;  %s44_s1 = sshll.u32 %s821_s2, 4  ;;  %s45_s1 = int_to_ptr.hbm [resolvable:$true] %s44_s1 }
   0x8   :  { %s20_s29 = sshll.u32 %s700_s28, 4  ;;  %s57_s8 = sshll.u32 %s822_s3, 4  ;;  %s21_s29 = int_to_ptr.vmem [resolvable:$true] %s20_s29  ;;  %s58_s8 = int_to_ptr.hbm [resolvable:$true] %s57_s8 }
   0x9   :  { %26 = dma.hbm_to_vmem [thread:$0]  %s19_s25, 256, %s21_s29, [#allocation3], %s698_s26, %s698_s26, %s699_s27  }
   0xa   :  { %s701_s9 = smov [#allocation7]   ;;  %s702_s11 = smov [#allocation8]  }
   0xb   :  { %s46_s10 = sshll.u32 %s701_s9, 4  ;;  %s59_s2 = sshll.u32 %s702_s11, 4  ;;  %s47_s10 = int_to_ptr.vmem [resolvable:$true] %s46_s10  ;;  %s60_s2 = int_to_ptr.vmem [resolvable:$true] %s59_s2 }
   0xc   :  { %52 = dma.hbm_to_vmem [thread:$0]  %s45_s1, 1024, %s47_s10, [#allocation6], %s698_s26, %s698_s26, %s699_s27  }
   0xd   :  { %65 = dma.hbm_to_vmem [thread:$0]  %s58_s8, 512, %s60_s2, [#allocation9], %s698_s26, %s698_s26, %s699_s27  }
   0xe   :  { %689 = dma.done.wait [#allocation3], 256  }
   0xf   :  { %690 = vsyncadd [#allocation3], 4294967040 }
  0x10   :  { %691 = dma.done.wait [#allocation6], 1280  }
  0x11   :  { %692 = vsyncadd [#allocation6], 4294966016 }
  0x12   :  { %693 = dma.done.wait [#allocation9], 512  }
  0x13   :  { %694 = vsyncadd [#allocation9], 4294966784  ;;  %v86_v0 = vld [vmem:[#allocation5] sm:$0xff]  ;;  %v106_v1 = vld [vmem:[#allocation7 + $0x38] sm:$0xff]  ;;  %s703_s3 = smov 32   ;;  %vm96_vm0 = vcmask 261120  }
  0x14   :  { %90 = vrot.lane.b32.xlu0 %v86_v0, %s703_s3  ;;  %122 = vmatpush.msra.mxu0 %v106_v1  ;;  %v105_v2 = vld [vmem:[#allocation7 + $0x30] sm:$0xff]  ;;  %v104_v3 = vld [vmem:[#allocation7 + $0x28] sm:$0xff]  ;;  %v103_v4 = vld [vmem:[#allocation7 + $0x20] sm:$0xff]  ;;  %vm107_vm1 = vcmask 523264   ;;  %s704_s12 = smov 64   ;;  %s705_s13 = smov 112  }
  0x15   :  { %v87_v5 = vld [vmem:[#allocation5 + $0x8] sm:$0xff]  ;;  %v101_v7 = vld [vmem:[#allocation7 + $0x10] sm:$0xff]  ;;  %v100_v8 = vld [vmem:[#allocation7 + $0x8] sm:$0xff]  ;;  %vm145_vm2 = vcmask 130048   ;;  %vm248_vm3 = vcmask 64512   ;;  %s706_s14 = smov 96  }
  0x16   :  { %123 = vmatpush.msra.mxu0 %v105_v2  ;;  %v102_v6 = vld [vmem:[#allocation7 + $0x18] sm:$0xff]  ;;  %v99_v9 = vld [vmem:[#allocation7] sm:$0xff]  ;;  %v85_v13 = vld [vmem:[#allocation2 + $0x8] sm:$0xff]  ;;  %s707_s15 = smov 16   ;;  %s708_s18 = smov [#allocation10]  }
  0x17   :  { %v84_v10 = vld [vmem:[#allocation2] sm:$0xff]  ;;  %s502_s19 = sshll.u32 %s708_s18, 4  ;;  %s504_s22 = sshll.u32 %s824_s5, 4  ;;  %s503_s19 = int_to_ptr.vmem [resolvable:$true] %s502_s19  ;;  %s505_s22 = int_to_ptr.hbm [resolvable:$true] %s504_s22 }
  0x18   :  { %124 = vmatpush.msra.mxu0 %v104_v3 }
  0x1a   :  { %125 = vmatpush.msra.mxu0 %v103_v4 }
  0x1c   :  { %92 = vrot.lane.b32.xlu0 %v87_v5, %s703_s3  ;;  %126 = vmatpush.msra.mxu0 %v102_v6 }
  0x1e   :  { %127 = vmatpush.msra.mxu0 %v101_v7 }
  0x20   :  { %128 = vmatpush.msra.mxu0 %v100_v8 }
  0x22   :  { %129 = vmatpush.msra.mxu0 %v99_v9 }
  0x86   :  { %v91_v11 = vpop.permute.xlu0 %90 }
  0x87   :  { %v97_v12 = vsel %vm96_vm0, %v84_v10, %v91_v11 }
  0x88   :  { %519 = vmatmul.msk.f32.vlgmr.msra.gmra.mxu0 %vm107_vm1, %v97_v12 }
  0x8e   :  { %v93_v14 = vpop.permute.xlu0 %92 }
  0x8f   :  { %v98_v15 = vsel %vm96_vm0, %v85_v13, %v93_v14 }
  0x90   :  { %520 = vmatmul.msk.f32.gmra.mxu0 %vm107_vm1, %v98_v15 }
 0x105   :  { %v131_v16 = vpop.f32.mrf.mxu0 }
 0x106   :  { %143 = vrot.lane.b32.xlu2 %v131_v16, %s704_s12  ;;  %139 = vrot.lane.b32.xlu1 %v131_v16, %s705_s13 }
 0x10d   :  { %v765_v17 = vpop.f32.mrf.mxu0 }
 0x10e   :  { %141 = vrot.lane.b32.xlu1 %v765_v17, %s705_s13 }
 0x116   :  { %170 = vrot.lane.b32.xlu1 %v765_v17, %s704_s12 }
 0x160   :  { %v144_v18 = vpop.permute.xlu2 %143 }
 0x161   :  { %521 = vmatpush.xpose.msk.msra.mxu1 %vm145_vm2, %v144_v18 }
 0x164   :  { %522 = vmatmul.msk.f32.vlgmr.msra.gmra.mxu1 %vm145_vm2, %v131_v16 }
 0x178   :  { %v771_v19 = vpop.permute.xlu1 %139 }
 0x179   :  { %196 = vrot.lane.b32.xlu2 %v771_v19, %s704_s12 }
 0x180   :  { %v774_v20 = vpop.permute.xlu1 %141 }
 0x181   :  { %222 = vrot.lane.b32.xlu0 %v774_v20, %s704_s12  ;;  %v547_v60 = vpack.i.bf16 %v774_v20, %v771_v19 }
 0x188   :  { %v171_v21 = vpop.permute.xlu1 %170 }
 0x189   :  { %523 = vmatpush.xpose.msk.msra.mxu2 %vm145_vm2, %v171_v21 }
 0x18c   :  { %524 = vmatmul.msk.f32.vlgmr.msra.gmra.mxu2 %vm145_vm2, %v765_v17 }
 0x1d3   :  { %v197_v22 = vpop.permute.xlu2 %196 }
 0x1d4   :  { %525 = vmatpush.xpose.msk.msra.mxu3 %vm145_vm2, %v197_v22 }
 0x1d7   :  { %526 = vmatmul.msk.f32.vlgmr.msra.gmra.mxu3 %vm145_vm2, %v771_v19 }
 0x1e1   :  { %v167_v23 = vpop.f32.mrf.mxu1 }
 0x1e2   :  { %v249_v24 = vsel %vm248_vm3, %v167_v23, -inf }
 0x1e3   :  { %250 = vmax.xlane.f32.xlu2 %v249_v24 }
 0x1f3   :  { %v223_v25 = vpop.permute.xlu0 %222 }
 0x1f4   :  { %527 = vmatpush.xpose.msk.msrb.mxu1 %vm145_vm2, %v223_v25 }
 0x1f7   :  { %528 = vmatmul.msk.f32.vlgmr.msrb.gmra.mxu1 %vm145_vm2, %v774_v20 }
 0x20f   :  { %v193_v26 = vpop.f32.mrf.mxu2 }
 0x210   :  { %v252_v27 = vsel %vm248_vm3, %v193_v26, -inf }
 0x211   :  { %253 = vmax.xlane.f32.xlu2 %v252_v27 }
 0x256   :  { %v251_v28 = vpop.xlane.xlu2 %250 }
 0x257   :  { %v261_v29 = vsub.f32 %v167_v23, %v251_v28 }
 0x259   :  { %v265_v30 = vmul.f32 1.442695, %v261_v29 }
 0x25a   :  { %v219_v31 = vpop.f32.mrf.mxu3 }
 0x25b   :  { %553 = vpow2.f32 %v265_v30  ;;  %v255_v32 = vsel %vm248_vm3, %v219_v31, -inf }
 0x25c   :  { %256 = vmax.xlane.f32.xlu0 %v255_v32 }
 0x261   :  { %v554_v33 = vpop.eup %553 }
 0x262   :  { %v273_v34 = vsel %vm248_vm3, %v554_v33, 0.0 }
 0x263   :  { %274 = vadd.xlane.f32.xlu2 %v273_v34 }
 0x274   :  { %v245_v35 = vpop.f32.mrf.mxu1 }
 0x275   :  { %v258_v36 = vsel %vm248_vm3, %v245_v35, -inf }
 0x276   :  { %259 = vmax.xlane.f32.xlu1 %v258_v36 }
 0x27b   :  { %345 = vrot.lane.b32.xlu2 %v131_v16, %s706_s14 }
 0x284   :  { %v254_v37 = vpop.xlane.xlu2 %253 }
 0x285   :  { %v262_v58 = vsub.f32 %v193_v26, %v254_v37 }
 0x287   :  { %v267_v61 = vmul.f32 1.442695, %v262_v58 }
 0x2cf   :  { %v257_v38 = vpop.xlane.xlu0 %256 }
 0x2d0   :  { %v263_v39 = vsub.f32 %v219_v31, %v257_v38 }
 0x2d2   :  { %v269_v40 = vmul.f32 1.442695, %v263_v39 }
 0x2d4   :  { %555 = vpow2.f32 %v269_v40 }
 0x2d6   :  { %v275_v41 = vpop.xlane.xlu2 %274 }
 0x2d7   :  { %557 = vrcp.f32 %v275_v41  ;;  %v296_v48 = vand.u32 2147483648, %v275_v41  ;;  %v294_v50 = vand.u32 2147483647, %v275_v41  ;;  %vm290_vm5 = vweird.f32 %v275_v41 }
 0x2d9   :  { %v297_v52 = vor.u32 1.1754944e-38, %v296_v48  ;;  %vm295_vm7 = vcmp.eq.f32.partialorder %v294_v50, 8.507059e+37  ;;  %v459_v48 = vld [vmem:[#allocation8] sm:$0xff] }
 0x2da   :  { %v556_v42 = vpop.eup %555 }
 0x2db   :  { %v279_v43 = vsel %vm248_vm3, %v556_v42, 0.0 }
 0x2dc   :  { %280 = vadd.xlane.f32.xlu0 %v279_v43  ;;  %v462_v43 = vld [vmem:[#allocation8 + $0x18] sm:$0xff] }
 0x2dd   :  { %v558_v44 = vpop.eup %557 }
 0x2de   :  { %v286_v45 = vmul.f32 %v558_v44, %v275_v41  ;;  %v346_v46 = vpop.permute.xlu2 %345  ;;  %vm291_vm4 = vweird.f32 %v558_v44 }
 0x2df   :  { %366 = vmatpush.msrb.mxu2 %v346_v46  ;;  %vm292_vm6 = vmor %vm290_vm5, %vm291_vm4 }
 0x2e0   :  { %v287_v47 = vsub.f32 1.0, %v286_v45  ;;  %v460_v45 = vld [vmem:[#allocation8 + $0x8] sm:$0xff] }
 0x2e2   :  { %v288_v49 = vmul.f32 %v558_v44, %v287_v47 }
 0x2e4   :  { %v289_v51 = vadd.f32 %v558_v44, %v288_v49 }
 0x2e6   :  { %v293_v53 = vsel %vm292_vm6, %v558_v44, %v289_v51  ;;  %v461_v44 = vld [vmem:[#allocation8 + $0x10] sm:$0xff] }
 0x2e7   :  { %v298_v54 = vsel %vm295_vm7, %v297_v52, %v293_v53 }
 0x2e8   :  { %v299_v55 = vmul.f32 %v554_v33, %v298_v54  ;;  %v552_v54 = vld [vmem:[%s823_s4] ss:$0 sm:$0xff] }
 0x2e9   :  { %v260_v56 = vpop.xlane.xlu1 %259 }
 0x2ea   :  { %v264_v57 = vsub.f32 %v245_v35, %v260_v56  ;;  %529 = vmatmul.msk.f32.vlgmr.msrb.gmra.mxu2 %vm248_vm3, %v299_v55 }
 0x2ec   :  { %v271_v59 = vmul.f32 1.442695, %v264_v57 }
 0x2ee   :  { %559 = vpow2.f32 %v271_v59 }
 0x2ef   :  { %561 = vpow2.f32 %v267_v61 }
 0x2f0   :  { %548 = vrot.lane.b32.xlu0 %v547_v60, %s706_s14 }
 0x2f4   :  { %v560_v62 = vpop.eup %559 }
 0x2f5   :  { %v282_v63 = vsel %vm248_vm3, %v560_v62, 0.0  ;;  %v562_v0 = vpop.eup %561 }
 0x2f6   :  { %283 = vadd.xlane.f32.xlu1 %v282_v63  ;;  %v276_v1 = vsel %vm248_vm3, %v562_v0, 0.0 }
 0x2fe   :  { %277 = vadd.xlane.f32.xlu1 %v276_v1 }
 0x317   :  { %371 = vrot.lane.b32.xlu1 %v765_v17, %s706_s14 }
 0x34f   :  { %v281_v2 = vpop.xlane.xlu0 %280 }
 0x350   :  { %563 = vrcp.f32 %v281_v2  ;;  %v326_v7 = vand.u32 2147483648, %v281_v2  ;;  %v324_v8 = vand.u32 2147483647, %v281_v2  ;;  %vm320_vm9 = vweird.f32 %v281_v2 }
 0x352   :  { %v327_v11 = vor.u32 1.1754944e-38, %v326_v7  ;;  %vm325_vm11 = vcmp.eq.f32.partialorder %v324_v8, 8.507059e+37 }
 0x356   :  { %v564_v3 = vpop.eup %563 }
 0x357   :  { %v316_v4 = vmul.f32 %v564_v3, %v281_v2  ;;  %vm321_vm8 = vweird.f32 %v564_v3 }
 0x358   :  { %vm322_vm10 = vmor %vm320_vm9, %vm321_vm8 }
 0x359   :  { %v317_v5 = vsub.f32 1.0, %v316_v4 }
 0x35b   :  { %v318_v6 = vmul.f32 %v564_v3, %v317_v5 }
 0x35d   :  { %v319_v9 = vadd.f32 %v564_v3, %v318_v6 }
 0x35f   :  { %v323_v10 = vsel %vm322_vm10, %v564_v3, %v319_v9 }
 0x360   :  { %v328_v12 = vsel %vm325_vm11, %v327_v11, %v323_v10 }
 0x361   :  { %v329_v16 = vmul.f32 %v556_v42, %v328_v12 }
 0x362   :  { %v549_v13 = vpop.permute.xlu0 %548 }
 0x363   :  { %v551_v14 = vunpack.i.h.bf16 %v549_v13  ;;  %v550_v15 = vunpack.i.l.bf16 %v549_v13 }
 0x365   :  { %418 = vmatpush.msra.mxu1 %v550_v15  ;;  %444 = vmatpush.msra.mxu2 %v551_v14 }
 0x366   :  { %531 = vmatmul.msk.f32.vlgmr.msra.gmra.mxu1 %vm248_vm3, %v329_v16 }
 0x369   :  { %v284_v17 = vpop.xlane.xlu1 %283 }
 0x36a   :  { %565 = vrcp.f32 %v284_v17  ;;  %v341_v22 = vand.u32 2147483648, %v284_v17  ;;  %v339_v24 = vand.u32 2147483647, %v284_v17  ;;  %vm335_vm13 = vweird.f32 %v284_v17 }
 0x36c   :  { %v342_v27 = vor.u32 1.1754944e-38, %v341_v22  ;;  %vm340_vm15 = vcmp.eq.f32.partialorder %v339_v24, 8.507059e+37 }
 0x36d   :  { %v368_v46 = vpop.f32.mrf.mxu2 }
 0x370   :  { %v566_v18 = vpop.eup %565 }
 0x371   :  { %v331_v19 = vmul.f32 %v566_v18, %v284_v17  ;;  %v278_v20 = vpop.xlane.xlu1 %277  ;;  %vm336_vm12 = vweird.f32 %v566_v18 }
 0x372   :  { %567 = vrcp.f32 %v278_v20  ;;  %vm337_vm14 = vmor %vm335_vm13, %vm336_vm12  ;;  %v311_v35 = vand.u32 2147483648, %v278_v20  ;;  %vm305_vm4 = vweird.f32 %v278_v20  ;;  %v309_v36 = vand.u32 2147483647, %v278_v20 }
 0x373   :  { %v332_v21 = vsub.f32 1.0, %v331_v19 }
 0x374   :  { %v312_v38 = vor.u32 1.1754944e-38, %v311_v35  ;;  %vm310_vm6 = vcmp.eq.f32.partialorder %v309_v36, 8.507059e+37 }
 0x375   :  { %v333_v23 = vmul.f32 %v566_v18, %v332_v21 }
 0x377   :  { %v334_v25 = vadd.f32 %v566_v18, %v333_v23 }
 0x378   :  { %v568_v26 = vpop.eup %567 }
 0x379   :  { %v338_v28 = vsel %vm337_vm14, %v566_v18, %v334_v25  ;;  %v301_v29 = vmul.f32 %v568_v26, %v278_v20  ;;  %vm306_vm1 = vweird.f32 %v568_v26 }
 0x37a   :  { %v343_v30 = vsel %vm340_vm15, %v342_v27, %v338_v28  ;;  %vm307_vm5 = vmor %vm305_vm4, %vm306_vm1 }
 0x37b   :  { %v302_v31 = vsub.f32 1.0, %v301_v29  ;;  %v344_v32 = vmul.f32 %v560_v62, %v343_v30 }
 0x37d   :  { %v303_v33 = vmul.f32 %v568_v26, %v302_v31  ;;  %532 = vmatmul.msk.f32.vlgmr.msra.gmra.mxu2 %vm248_vm3, %v344_v32 }
 0x37f   :  { %v304_v34 = vadd.f32 %v568_v26, %v303_v33 }
 0x381   :  { %v308_v37 = vsel %vm307_vm5, %v568_v26, %v304_v34 }
 0x382   :  { %v313_v39 = vsel %vm310_vm6, %v312_v38, %v308_v37 }
 0x383   :  { %v314_v41 = vmul.f32 %v562_v0, %v313_v39 }
 0x389   :  { %v372_v40 = vpop.permute.xlu1 %371 }
 0x38a   :  { %392 = vmatpush.msrb.mxu3 %v372_v40 }
 0x38b   :  { %530 = vmatmul.msk.f32.vlgmr.msrb.gmra.mxu3 %vm248_vm3, %v314_v41 }
 0x38c   :  { %485 = vmatpush.msra.mxu3 %v462_v43 }
 0x38e   :  { %486 = vmatpush.msra.mxu3 %v461_v44 }
 0x390   :  { %487 = vmatpush.msra.mxu3 %v460_v45 }
 0x392   :  { %488 = vmatpush.msra.mxu3 %v459_v48 }
 0x3e3   :  { %v420_v42 = vpop.f32.mrf.mxu1 }
 0x3e4   :  { %451 = vrot.lane.b32.xlu0 %v420_v42, %s707_s15 }
 0x400   :  { %v446_v47 = vpop.f32.mrf.mxu2 }
 0x401   :  { %453 = vrot.lane.b32.xlu2 %v446_v47, %s707_s15 }
 0x40e   :  { %v394_v52 = vpop.f32.mrf.mxu3 }
 0x456   :  { %v452_v49 = vpop.permute.xlu0 %451 }
 0x457   :  { %v457_v50 = vsel %vm145_vm2, %v368_v46, %v452_v49 }
 0x458   :  { %533 = vmatmul.msk.f32.vlgmr.msra.gmra.mxu3 %vm96_vm0, %v457_v50 }
 0x45b   :  { %v454_v51 = vpop.permute.xlu2 %453 }
 0x45c   :  { %v458_v53 = vsel %vm145_vm2, %v394_v52, %v454_v51 }
 0x460   :  { %534 = vmatmul.msk.f32.gmra.mxu3 %vm96_vm0, %v458_v53 }
 0x4db   :  { %v490_v55 = vpop.f32.mrf.mxu3 }
 0x4dc   :  { %v491_v56 = vadd.f32 %v552_v54, %v490_v55 }
 0x4de   :  { %496 = vst.msk [vmem:[#allocation10] sm:$0xff] %vm96_vm0, %v491_v56 }
 0x4e3   :  { %v493_v57 = vpop.f32.mrf.mxu3 }
 0x4e4   :  { %v494_v58 = vadd.f32 %v552_v54, %v493_v57 }
 0x4e6   :  { %497 = vst.msk [vmem:[#allocation10 + $0x8] sm:$0xff] %vm96_vm0, %v494_v58 }
 0x4e7   :  { %510 = dma.vmem_to_hbm [thread:$0]  %s503_s19, 256, %s505_s22, [#allocation4], %s698_s26, %s698_s26, %s699_s27  }
 0x4e8   :  { %695 = dma.done.wait [#allocation4], 256  }
 0x4e9   :  { %696 = vsyncadd [#allocation4], 4294967040 }
 0x4ea   :  { %515 = vsyncpa [#allocation3], 1 }
 0x4eb   :  { %516 = vsyncpa [#allocation6], 1 }
 0x4ec   :  { %517 = vsyncpa [#allocation9], 1 }
 0x4ed   :  { %518 = vsyncpa [#allocation4], 1 }

</bundles_post_ra>
